<compile_context>
chip_gen: v7x
topology: tpu7x:2x2x1
jax: 0.10.0
libtpu: 0.0.40
codegen_flags: <defaults>
</compile_context>

<pallas_src>
import jax
import jax.numpy as jnp
from jax.experimental import pallas as pl
from jax.experimental.pallas import tpu as pltpu


def _one_kernel(x_hbm_ref, o_ref):
    """Writes the constant 1.0.

    x_hbm_ref: HBM ref (N, C, H, W) f32 — intentionally never read
               (`One.forward` ignores its input).
    o_ref:     SMEM (1,) f32 — the constant output.
    """
    del x_hbm_ref  # `One` routes everything left: output is 1.0 regardless of x.
    o_ref[0] = jnp.float32(1.0)


def one_forward(x):
    """Pallas version of One.forward.

    x: any array (e.g. (N, C, H, W) float32) — ignored, kept in HBM.
    returns a 0-d float32 array equal to 1.0 (JAX analogue of the Python
    float 1.0 returned by the PyTorch module).
    """
    out = pl.pallas_call(
        _one_kernel,
        out_shape=jax.ShapeDtypeStruct((1,), jnp.float32),
        in_specs=[
            # Leave x where it is; no HBM->VMEM DMA is ever issued for it.
            pl.BlockSpec(memory_space=pl.ANY),
        ],
        out_specs=pl.BlockSpec(memory_space=pltpu.MemorySpace.SMEM),
    )(x.astype(jnp.float32))
    return out[0]


def one_reference(x):
    """Pure-JAX reference matching the PyTorch forward."""
    del x
    return jnp.float32(1.0)


if __name__ == "__main__":
    # Small deterministic example input, consistent with an NCHW image batch.
    N, C, H, W = 2, 4, 16, 16
    key = jax.random.PRNGKey(0)
    x = jax.random.normal(key, (N, C, H, W), dtype=jnp.float32)

    out = jax.block_until_ready(one_forward(x))
    ref = one_reference(x)

    assert out.shape == (), out.shape
    assert jnp.allclose(out, ref), (out, ref)
    assert float(out) == 1.0, float(out)
    print("KERNEL_OK")
</pallas_src>

<mosaic_0001>
module attributes {stable_mosaic.version = 11 : i64} {
  func.func @_one_kernel(%arg0: memref<2x4x16x16xf32, #tpu.memory_space<any>>, %arg1: memref<1xf32, #tpu.memory_space<smem>>) attributes {dimension_semantics = [], scalar_prefetch = 0 : i64, scratch_operands = 0 : i64, tpu.core_type = #tpu.core_type<tc>} {
    %cst = arith.constant 1.000000e+00 : f32
    %c0 = arith.constant 0 : index
    %0 = memref.load %arg1[%c0] : memref<1xf32, #tpu.memory_space<smem>>
    memref.store %cst, %arg1[%c0] : memref<1xf32, #tpu.memory_space<smem>>
    return
  }
}

</mosaic_0001>

<bundles_post_ra>
// kernel: tpu_custom_call.1
= control target key start
LH: loop header
LB: loop body
LE: loop exit
PB: predicated region body
PF: predicated region fallthrough
CT: control target
= control target key end

     0   :  { %6 = vsyncpa [#allocation3], 0  ;;  %s36_s6 = smov 1.0   ;;  %s60_s0 = inlined_call_operand.hbm [shape: f32[2,4,16,16], index: 0, kind: input, shape index: {}]   ;;  %s61_s1 = inlined_call_operand.hbm [shape: f32[1], index: 1, kind: output, shape index: {}]  }
   0x1   :  { %8 = sst [smem:[#allocation2]] %s36_s6  ;;  %s24_s9 = scalar_lea.hbm %s61_s1, 16 }
   0x2   :  { %p25_p0 = scmp.ne.s32.totalorder %s61_s1, %s24_s9  ;;  %p28_p1 = scmp.lt.u32.totalorder %s24_s9, %s61_s1 }
   0x4   :  { %p30_p2 = pnand %p28_p1, %p25_p0 }
   0x6   :  { %33 = shalt.err (!%p30_p2)
}
   0x7   :  { %s37_s0 = smov [#allocation2]  }
   0x8   :  { %16 = dma.smem_to_hbm %s37_s0, 16, %s61_s1, [#allocation3]  }
   0x9   :  { %34 = dma.done.wait [#allocation3], 16  }
   0xa   :  { %35 = vsyncadd [#allocation3], 4294967280 }
   0xb   :  { %20 = sfence }
   0xc   :  { %21 = vsyncpa [#allocation3], 1 }

</bundles_post_ra>
